<compile_context>
chip_gen: v7x
topology: tpu7x:2x2x1
jax: 0.10.0
libtpu: 0.0.40
codegen_flags: <defaults>
</compile_context>

<pallas_src>
from enum import Enum
from functools import partial

import jax
import jax.numpy as jnp
from jax.experimental import pallas as pl
from jax.experimental.pallas import tpu as pltpu


def _gelu(x):
    # tanh-approximate GELU (EUP-friendly on TPU)
    return jax.nn.gelu(x, approximate=True)


# ---------------------------------------------------------------------------
# Fused AE forward kernel: y = decode(encode(x)) for one (batch, time-tile)
# Channels-first: channels on sublanes, time on lanes.
# ---------------------------------------------------------------------------

def _ae_fused_kernel(x_ref, we_ref, be_ref, wirm_ref, wd_ref, bd_ref,
                     wd2_ref, bd2_ref, y_ref, *, tile_t, t_real):
    """
    x_ref   : (1, Din, T_p + 4)  bf16 time-padded input, resident per batch element
    we_ref  : (3, H, Din)        encoder conv taps (bf16)
    be_ref  : (H, 1)             encoder conv bias (bf16)
    wirm_ref: (L, H)             pre-multiplied IRM bottleneck (W_irm0 @ W_irm1)^T (bf16)
    wd_ref  : (3, H, L)          decoder conv taps (bf16)
    bd_ref  : (H, 1)             decoder conv bias (bf16)
    wd2_ref : (Dout, H)          1x1 output conv (bf16)
    bd2_ref : (Dout, 1)          output bias (f32)
    y_ref   : (1, Dout, tile_t)  output tile
    """
    cdtype = we_ref.dtype
    j = pl.program_id(1)
    t0 = j * tile_t                      # global start (time) of this output tile
    tz = tile_t + 2                      # latent columns needed (1-col halo each side)

    # aligned window load: column i holds x[:, t0 - 2 + i] (x is left-padded by 2 zeros)
    start = pl.multiple_of(t0, 128)
    xw = x_ref[0, :, pl.ds(start, tile_t + 4)]                     # (Din, tile_t+4)

    # ---- encoder: conv1d(k=3,'same') as 3 accumulated MXU dots (f32 acc), bias+GELU in bf16
    h = jnp.dot(we_ref[0], xw[:, 0:tz], preferred_element_type=jnp.float32)
    h += jnp.dot(we_ref[1], xw[:, 1:tz + 1], preferred_element_type=jnp.float32)
    h += jnp.dot(we_ref[2], xw[:, 2:tz + 2], preferred_element_type=jnp.float32)
    h = _gelu(h.astype(cdtype) + be_ref[...])                      # (H, tz) bf16

    # ---- fused IRM bottleneck (pre-multiplied 1x1 convs) + tanh
    z = jnp.dot(wirm_ref[...], h, preferred_element_type=jnp.float32)
    z = jnp.tanh(z.astype(cdtype))                                 # (L, tz) bf16

    # zero 'same' padding of the latent: column i is the latent at global time t0 - 1 + i;
    # mask columns outside [0, T) (handles both sequence edges and the tile tail pad).
    gt = jax.lax.broadcasted_iota(jnp.int32, (1, tz), 1) + (t0 - 1)
    z = jnp.where((gt >= 0) & (gt < t_real), z, jnp.zeros_like(z))

    # ---- decoder: conv1d(k=3,'same') as 3 accumulated dots, bias+GELU in bf16
    hd = jnp.dot(wd_ref[0], z[:, 0:tile_t], preferred_element_type=jnp.float32)
    hd += jnp.dot(wd_ref[1], z[:, 1:tile_t + 1], preferred_element_type=jnp.float32)
    hd += jnp.dot(wd_ref[2], z[:, 2:tile_t + 2], preferred_element_type=jnp.float32)
    hd = _gelu(hd.astype(cdtype) + bd_ref[...])                    # (H, tile_t) bf16

    # ---- 1x1 output conv
    y = jnp.dot(wd2_ref[...], hd, preferred_element_type=jnp.float32) + bd2_ref[...]
    y_ref[0, :, :] = y.astype(y_ref.dtype)


# ---------------------------------------------------------------------------
# Wrapper: tiling / weight prep / pallas_call (no transposes, channels-first)
# ---------------------------------------------------------------------------

@partial(jax.jit, static_argnames=("tile_t", "compute_dtype", "out_dtype"))
def ae_forward(x_bdt, params, *, tile_t=None, compute_dtype=jnp.bfloat16,
               out_dtype=jnp.bfloat16):
    """Fused IRMAE forward pass: decode(encode(x)).  x_bdt: (B, Din, T) -> (B, Dout, T)."""
    B, Din, T = x_bdt.shape
    W_e1 = params["W_e1"]                                       # (3, Din, H)
    H = W_e1.shape[2]
    # linear bottleneck: no nonlinearity between the two 1x1 convs -> pre-multiply (f32)
    W_irm = jnp.dot(params["W_irm0"].astype(jnp.float32),
                    params["W_irm1"].astype(jnp.float32))       # (H, L)
    L = W_irm.shape[1]
    W_d1 = params["W_d1"]                                       # (3, L, H)
    W_d2 = params["W_d2"]                                       # (H, Dout)
    Dout = W_d2.shape[1]

    # time tile: lane-dense multiple of 128; single tile for short sequences
    if tile_t is None:
        tile_t = 1024
    tile_t = max(128, -(-int(tile_t) // 128) * 128)
    if tile_t >= T:
        tile_t = -(-T // 128) * 128
    n_t = -(-T // tile_t)
    T_p = n_t * tile_t

    # bf16 cast fused with the small time pad (2-col halo left, 2-col halo + tile tail right);
    # no transpose and no separate pad pass over x.
    x_pad = jnp.pad(x_bdt.astype(compute_dtype), ((0, 0), (0, 0), (2, 2 + T_p - T)))

    # host-side weight prep (tiny): channels-first orientation, bf16 MXU operands
    we = jnp.transpose(W_e1, (0, 2, 1)).astype(compute_dtype)       # (3, H, Din)
    wirm = jnp.transpose(W_irm).astype(compute_dtype)               # (L, H)
    wd = jnp.transpose(W_d1, (0, 2, 1)).astype(compute_dtype)       # (3, H, L)
    wd2 = jnp.transpose(W_d2).astype(compute_dtype)                 # (Dout, H)
    be = params["b_e1"].reshape(H, 1).astype(compute_dtype)
    bd = params["b_d1"].reshape(H, 1).astype(compute_dtype)
    bd2 = params["b_d2"].reshape(Dout, 1).astype(jnp.float32)

    cbytes = jnp.dtype(compute_dtype).itemsize
    obytes = jnp.dtype(out_dtype).itemsize
    w_bytes = (we.size + wirm.size + wd.size + wd2.size + be.size + bd.size) * cbytes \
              + bd2.size * 4
    flops = 2 * B * T_p * (3 * Din * H + H * L + 3 * L * H + H * Dout)
    transcendentals = B * T_p * (2 * H + L)
    bytes_accessed = x_pad.size * cbytes + B * T_p * Dout * obytes + w_bytes

    # scoped-VMEM sizing: default double-buffered blocks + live intermediates + headroom
    in_blk = Din * (T_p + 4) * cbytes
    out_blk = Dout * tile_t * obytes
    interm = (3 * Din + 4 * H + 3 * L + 2 * Dout) * (tile_t + 4) * 4
    vmem_limit = int(min(max(2 * (in_blk + out_blk + w_bytes) + interm + (8 << 20),
                             32 << 20), 64 << 20))

    y = pl.pallas_call(
        partial(_ae_fused_kernel, tile_t=tile_t, t_real=T),
        out_shape=jax.ShapeDtypeStruct((B, Dout, T_p), out_dtype),
        grid_spec=pltpu.PrefetchScalarGridSpec(
            num_scalar_prefetch=0,
            grid=(B, n_t),
            in_specs=[
                # full padded input per batch element; block index constant in j
                # -> fetched once per batch, resident across the time tiles.
                pl.BlockSpec((1, Din, T_p + 4), lambda b, j: (b, 0, 0)),
                pl.BlockSpec((3, H, Din), lambda b, j: (0, 0, 0)),
                pl.BlockSpec((H, 1), lambda b, j: (0, 0)),
                pl.BlockSpec((L, H), lambda b, j: (0, 0)),
                pl.BlockSpec((3, H, L), lambda b, j: (0, 0, 0)),
                pl.BlockSpec((H, 1), lambda b, j: (0, 0)),
                pl.BlockSpec((Dout, H), lambda b, j: (0, 0)),
                pl.BlockSpec((Dout, 1), lambda b, j: (0, 0)),
            ],
            out_specs=pl.BlockSpec((1, Dout, tile_t), lambda b, j: (b, 0, j)),
        ),
        compiler_params=pltpu.CompilerParams(
            # batch is the megacore-parallel axis; time is sequential so v7x cores
            # don't each hold a duplicate of the resident per-batch input.
            dimension_semantics=("parallel", "arbitrary"),
            vmem_limit_bytes=vmem_limit),
        cost_estimate=pl.CostEstimate(flops=flops,
                                      transcendentals=transcendentals,
                                      bytes_accessed=bytes_accessed),
    )(x_pad, we, be, wirm, wd, bd, wd2, bd2)

    return y[:, :, :T]


# ---------------------------------------------------------------------------
# Pure-JAX f32 reference (unfused, two-matmul IRM) for validation
# ---------------------------------------------------------------------------

def ae_forward_ref(x_bdt, params):
    x = jnp.transpose(x_bdt, (0, 2, 1)).astype(jnp.float32)     # (B, T, Din)
    _, T, _ = x.shape
    xp = jnp.pad(x, ((0, 0), (1, 1), (0, 0)))
    h = sum(jnp.einsum("btd,dh->bth", xp[:, k:k + T, :], params["W_e1"][k])
            for k in range(3))
    h = _gelu(h + params["b_e1"])
    z = jnp.tanh(h @ params["W_irm0"] @ params["W_irm1"])
    zp = jnp.pad(z, ((0, 0), (1, 1), (0, 0)))
    hd = sum(jnp.einsum("btl,lh->bth", zp[:, k:k + T, :], params["W_d1"][k])
             for k in range(3))
    hd = _gelu(hd + params["b_d1"])
    y = hd @ params["W_d2"] + params["b_d2"]
    return jnp.transpose(y, (0, 2, 1))


# ---------------------------------------------------------------------------
# LCFM module (plumbing kept in Python/JAX, compute in the fused Pallas kernel)
# ---------------------------------------------------------------------------

class LCFM:
    class Mode(Enum):
        AE = "ae"
        CFM = "cfm"

    def __init__(self, ae_params, z_scale: float = 1.0, tile_t=None):
        self.ae_params = ae_params
        self.z_scale = z_scale
        self.tile_t = tile_t
        self._mode = None
        self._eval_tau = 0.5

    @property
    def mode(self):
        return self._mode

    def set_mode_(self, mode):
        self._mode = self.Mode(mode)

    def _scale(self, z):
        return z * self.z_scale

    def _unscale(self, z):
        return z / self.z_scale

    def eval_tau_(self, tau):
        self._eval_tau = tau

    def forward(self, x, y=None, psi0=None):
        """x, y, psi0: (b, d, t) mel-style tensors, matching the PyTorch module."""
        if self.mode == self.Mode.CFM:
            # TODO(synk): CFM submodule (ODE-based conditional flow matching) has no
            # reference implementation in the given snippet; only the AE path is built.
            raise NotImplementedError("CFM mode not implemented in this synthetic kernel")
        if psi0 is not None:
            # psi0 (and its tau/noise mixing) is only consumed by the CFM branch in the
            # reference module; it has no effect on the AE-mode output, so it is skipped.
            pass
        src = x if y is None else y
        # Mode.AE: h = ae.decode(ae.encode(src)).  z_scale is intentionally NOT applied
        # here — the reference only scales/unscales the latent around the CFM calls.
        return ae_forward(src, self.ae_params, tile_t=self.tile_t)


# ---------------------------------------------------------------------------
# Deterministic parameter init (synthetic; shapes follow an IRMAE-like AE)
# ---------------------------------------------------------------------------

def init_params(key, d_mel, hidden, latent):
    ks = jax.random.split(key, 8)
    s = 0.1
    return {
        "W_e1":   s * jax.random.normal(ks[0], (3, d_mel, hidden), jnp.float32),
        "b_e1":   s * jax.random.normal(ks[1], (1, hidden), jnp.float32),
        "W_irm0": s * jax.random.normal(ks[2], (hidden, latent), jnp.float32),
        "W_irm1": s * jax.random.normal(ks[3], (latent, latent), jnp.float32),
        "W_d1":   s * jax.random.normal(ks[4], (3, latent, hidden), jnp.float32),
        "b_d1":   s * jax.random.normal(ks[5], (1, hidden), jnp.float32),
        "W_d2":   s * jax.random.normal(ks[6], (hidden, d_mel), jnp.float32),
        "b_d2":   s * jax.random.normal(ks[7], (1, d_mel), jnp.float32),
    }


if __name__ == "__main__":
    key = jax.random.PRNGKey(0)
    B, D_MEL, T, HIDDEN, LATENT = 2, 16, 200, 32, 8

    params = init_params(key, D_MEL, HIDDEN, LATENT)
    # tile_t=128 so the demo exercises multiple lane-dense time tiles + halo/tail masking.
    model = LCFM(params, z_scale=1.0, tile_t=128)
    model.set_mode_("ae")

    x = jax.random.normal(jax.random.fold_in(key, 123), (B, D_MEL, T), jnp.float32)

    # inference path: decode(encode(x))
    h = jax.block_until_ready(model.forward(x))
    assert h.shape == (B, D_MEL, T), h.shape
    hf = h.astype(jnp.float32)
    assert bool(jnp.all(jnp.isfinite(hf)))

    # numerical check vs. pure-JAX f32 reference (bf16 MXU/VPU + bf16 output -> loose tol)
    h_ref = ae_forward_ref(x, params)
    err = float(jnp.max(jnp.abs(hf - h_ref)))
    assert err < 5e-2, f"max abs err {err}"

    # training-style path with a target mel y (Mode.AE): decode(encode(y))
    y = jax.random.normal(jax.random.fold_in(key, 456), (B, D_MEL, T), jnp.float32)
    h2 = jax.block_until_ready(model.forward(x, y=y))
    assert h2.shape == (B, D_MEL, T)
    err2 = float(jnp.max(jnp.abs(h2.astype(jnp.float32) - ae_forward_ref(y, params))))
    assert err2 < 5e-2, f"max abs err {err2}"

    # short sequence, default tiling (single tile, T not a multiple of 128)
    model2 = LCFM(params, z_scale=1.0)
    model2.set_mode_("ae")
    x3 = jax.random.normal(jax.random.fold_in(key, 789), (B, D_MEL, 90), jnp.float32)
    h3 = jax.block_until_ready(model2.forward(x3))
    assert h3.shape == (B, D_MEL, 90)
    err3 = float(jnp.max(jnp.abs(h3.astype(jnp.float32) - ae_forward_ref(x3, params))))
    assert err3 < 5e-2, f"max abs err {err3}"

    print("KERNEL_OK")
</pallas_src>

<mosaic_0001>
module attributes {stable_mosaic.version = 11 : i64} {
  func.func @_ae_fused_kernel(%arg0: i32, %arg1: i32, %arg2: memref<1x16x260xbf16, #tpu.memory_space<vmem>>, %arg3: memref<3x32x16xbf16, #tpu.memory_space<vmem>>, %arg4: memref<32x1xbf16, #tpu.memory_space<vmem>>, %arg5: memref<8x32xbf16, #tpu.memory_space<vmem>>, %arg6: memref<3x32x8xbf16, #tpu.memory_space<vmem>>, %arg7: memref<32x1xbf16, #tpu.memory_space<vmem>>, %arg8: memref<16x32xbf16, #tpu.memory_space<vmem>>, %arg9: memref<16x1xf32, #tpu.memory_space<vmem>>, %arg10: memref<1x16x128xbf16, #tpu.memory_space<vmem>>) attributes {dimension_semantics = [#tpu.dimension_semantics<parallel>, #tpu.dimension_semantics<arbitrary>], iteration_bounds = array<i64: 2, 2>, scalar_prefetch = 0 : i64, scratch_operands = 0 : i64, tpu.core_type = #tpu.core_type<tc>, window_params = [{transform_indices = @transform_0, window_bounds = array<i64: 1, 16, 260>}, {pipeline_mode = #tpu.pipeline_mode<synchronous>, transform_indices = @transform_1, window_bounds = array<i64: 3, 32, 16>}, {pipeline_mode = #tpu.pipeline_mode<synchronous>, transform_indices = @transform_2, window_bounds = array<i64: 32, 1>}, {pipeline_mode = #tpu.pipeline_mode<synchronous>, transform_indices = @transform_3, window_bounds = array<i64: 8, 32>}, {pipeline_mode = #tpu.pipeline_mode<synchronous>, transform_indices = @transform_4, window_bounds = array<i64: 3, 32, 8>}, {pipeline_mode = #tpu.pipeline_mode<synchronous>, transform_indices = @transform_5, window_bounds = array<i64: 32, 1>}, {pipeline_mode = #tpu.pipeline_mode<synchronous>, transform_indices = @transform_6, window_bounds = array<i64: 16, 32>}, {pipeline_mode = #tpu.pipeline_mode<synchronous>, transform_indices = @transform_7, window_bounds = array<i64: 16, 1>}, {transform_indices = @transform_8, window_bounds = array<i64: 1, 16, 128>}]} {
    %c128_i32 = arith.constant 128 : i32
    %0 = arith.muli %arg1, %c128_i32 : i32
    %1 = tpu.assume_multiple %0, 128 : i32
    %c0 = arith.constant 0 : index
    %c0_0 = arith.constant 0 : index
    %2 = arith.index_cast %1 : i32 to index
    %3 = vector.load %arg2[%c0, %c0_0, %2] : memref<1x16x260xbf16, #tpu.memory_space<vmem>>, vector<1x16x132xbf16>
    %4 = vector.shape_cast %3 : vector<1x16x132xbf16> to vector<16x132xbf16>
    %c0_1 = arith.constant 0 : index
    %c0_2 = arith.constant 0 : index
    %c0_3 = arith.constant 0 : index
    %5 = vector.load %arg3[%c0_1, %c0_2, %c0_3] : memref<3x32x16xbf16, #tpu.memory_space<vmem>>, vector<1x32x16xbf16>
    %6 = vector.shape_cast %5 : vector<1x32x16xbf16> to vector<32x16xbf16>
    %7 = vector.extract_strided_slice %4 {offsets = [0, 0], sizes = [16, 130], strides = [1, 1]} : vector<16x132xbf16> to vector<16x130xbf16>
    %cst = arith.constant dense<0.000000e+00> : vector<32x130xf32>
    %8 = tpu.matmul %6, %7, %cst {dimension_numbers = #tpu.dot_dimension_numbers<[1], [0], [0], [1], [0, 0, 1, 1], [], []>} : vector<32x16xbf16>, vector<16x130xbf16>, vector<32x130xf32> -> vector<32x130xf32>
    %c1 = arith.constant 1 : index
    %c0_4 = arith.constant 0 : index
    %c0_5 = arith.constant 0 : index
    %9 = vector.load %arg3[%c1, %c0_4, %c0_5] : memref<3x32x16xbf16, #tpu.memory_space<vmem>>, vector<1x32x16xbf16>
    %10 = vector.shape_cast %9 : vector<1x32x16xbf16> to vector<32x16xbf16>
    %11 = vector.extract_strided_slice %4 {offsets = [0, 1], sizes = [16, 130], strides = [1, 1]} : vector<16x132xbf16> to vector<16x130xbf16>
    %cst_6 = arith.constant dense<0.000000e+00> : vector<32x130xf32>
    %12 = tpu.matmul %10, %11, %cst_6 {dimension_numbers = #tpu.dot_dimension_numbers<[1], [0], [0], [1], [0, 0, 1, 1], [], []>} : vector<32x16xbf16>, vector<16x130xbf16>, vector<32x130xf32> -> vector<32x130xf32>
    %13 = arith.addf %8, %12 : vector<32x130xf32>
    %c2 = arith.constant 2 : index
    %c0_7 = arith.constant 0 : index
    %c0_8 = arith.constant 0 : index
    %14 = vector.load %arg3[%c2, %c0_7, %c0_8] : memref<3x32x16xbf16, #tpu.memory_space<vmem>>, vector<1x32x16xbf16>
    %15 = vector.shape_cast %14 : vector<1x32x16xbf16> to vector<32x16xbf16>
    %16 = vector.extract_strided_slice %4 {offsets = [0, 2], sizes = [16, 130], strides = [1, 1]} : vector<16x132xbf16> to vector<16x130xbf16>
    %cst_9 = arith.constant dense<0.000000e+00> : vector<32x130xf32>
    %17 = tpu.matmul %15, %16, %cst_9 {dimension_numbers = #tpu.dot_dimension_numbers<[1], [0], [0], [1], [0, 0, 1, 1], [], []>} : vector<32x16xbf16>, vector<16x130xbf16>, vector<32x130xf32> -> vector<32x130xf32>
    %18 = arith.addf %13, %17 : vector<32x130xf32>
    %19 = arith.truncf %18 : vector<32x130xf32> to vector<32x130xbf16>
    %c0_10 = arith.constant 0 : index
    %c0_11 = arith.constant 0 : index
    %20 = vector.load %arg4[%c0_10, %c0_11] : memref<32x1xbf16, #tpu.memory_space<vmem>>, vector<32x1xbf16>
    %21 = vector.broadcast %20 : vector<32x1xbf16> to vector<32x130xbf16>
    %22 = arith.addf %19, %21 : vector<32x130xbf16>
    %23 = arith.mulf %22, %22 : vector<32x130xbf16>
    %24 = arith.mulf %22, %23 : vector<32x130xbf16>
    %cst_12 = arith.constant 4.467770e-02 : bf16
    %25 = vector.broadcast %cst_12 : bf16 to vector<32x130xbf16>
    %26 = arith.mulf %25, %24 : vector<32x130xbf16>
    %27 = arith.addf %22, %26 : vector<32x130xbf16>
    %cst_13 = arith.constant 7.968750e-01 : bf16
    %28 = vector.broadcast %cst_13 : bf16 to vector<32x130xbf16>
    %29 = arith.mulf %28, %27 : vector<32x130xbf16>
    %30 = math.tanh %29 : vector<32x130xbf16>
    %cst_14 = arith.constant 1.000000e+00 : bf16
    %31 = vector.broadcast %cst_14 : bf16 to vector<32x130xbf16>
    %32 = arith.addf %31, %30 : vector<32x130xbf16>
    %cst_15 = arith.constant 5.000000e-01 : bf16
    %33 = vector.broadcast %cst_15 : bf16 to vector<32x130xbf16>
    %34 = arith.mulf %33, %32 : vector<32x130xbf16>
    %35 = arith.mulf %22, %34 : vector<32x130xbf16>
    %c0_16 = arith.constant 0 : index
    %c0_17 = arith.constant 0 : index
    %36 = vector.load %arg5[%c0_16, %c0_17] : memref<8x32xbf16, #tpu.memory_space<vmem>>, vector<8x32xbf16>
    %cst_18 = arith.constant dense<0.000000e+00> : vector<8x130xf32>
    %37 = tpu.matmul %36, %35, %cst_18 {dimension_numbers = #tpu.dot_dimension_numbers<[1], [0], [0], [1], [0, 0, 1, 1], [], []>} : vector<8x32xbf16>, vector<32x130xbf16>, vector<8x130xf32> -> vector<8x130xf32>
    %38 = arith.truncf %37 : vector<8x130xf32> to vector<8x130xbf16>
    %39 = math.tanh %38 : vector<8x130xbf16>
    %40 = tpu.iota {dimensions = array<i32: 1>} : vector<1x130xi32>
    %c1_i32 = arith.constant 1 : i32
    %41 = arith.subi %0, %c1_i32 : i32
    %42 = vector.broadcast %41 : i32 to vector<1x130xi32>
    %43 = arith.addi %40, %42 : vector<1x130xi32>
    %c0_i32 = arith.constant 0 : i32
    %44 = vector.broadcast %c0_i32 : i32 to vector<1x130xi32>
    %45 = arith.cmpi sge, %43, %44 : vector<1x130xi32>
    %c200_i32 = arith.constant 200 : i32
    %46 = vector.broadcast %c200_i32 : i32 to vector<1x130xi32>
    %47 = arith.cmpi slt, %43, %46 : vector<1x130xi32>
    %48 = arith.andi %45, %47 : vector<1x130xi1>
    %cst_19 = arith.constant 0.000000e+00 : bf16
    %49 = vector.broadcast %cst_19 : bf16 to vector<8x130xbf16>
    %50 = vector.shape_cast %48 : vector<1x130xi1> to vector<1x130xi1>
    %51 = vector.broadcast %50 : vector<1x130xi1> to vector<8x130xi1>
    %52 = arith.select %51, %39, %49 : vector<8x130xi1>, vector<8x130xbf16>
    %c0_20 = arith.constant 0 : index
    %c0_21 = arith.constant 0 : index
    %c0_22 = arith.constant 0 : index
    %53 = vector.load %arg6[%c0_20, %c0_21, %c0_22] : memref<3x32x8xbf16, #tpu.memory_space<vmem>>, vector<1x32x8xbf16>
    %54 = vector.shape_cast %53 : vector<1x32x8xbf16> to vector<32x8xbf16>
    %55 = vector.extract_strided_slice %52 {offsets = [0, 0], sizes = [8, 128], strides = [1, 1]} : vector<8x130xbf16> to vector<8x128xbf16>
    %cst_23 = arith.constant dense<0.000000e+00> : vector<32x128xf32>
    %56 = tpu.matmul %54, %55, %cst_23 {dimension_numbers = #tpu.dot_dimension_numbers<[1], [0], [0], [1], [0, 0, 1, 1], [], []>} : vector<32x8xbf16>, vector<8x128xbf16>, vector<32x128xf32> -> vector<32x128xf32>
    %c1_24 = arith.constant 1 : index
    %c0_25 = arith.constant 0 : index
    %c0_26 = arith.constant 0 : index
    %57 = vector.load %arg6[%c1_24, %c0_25, %c0_26] : memref<3x32x8xbf16, #tpu.memory_space<vmem>>, vector<1x32x8xbf16>
    %58 = vector.shape_cast %57 : vector<1x32x8xbf16> to vector<32x8xbf16>
    %59 = vector.extract_strided_slice %52 {offsets = [0, 1], sizes = [8, 128], strides = [1, 1]} : vector<8x130xbf16> to vector<8x128xbf16>
    %cst_27 = arith.constant dense<0.000000e+00> : vector<32x128xf32>
    %60 = tpu.matmul %58, %59, %cst_27 {dimension_numbers = #tpu.dot_dimension_numbers<[1], [0], [0], [1], [0, 0, 1, 1], [], []>} : vector<32x8xbf16>, vector<8x128xbf16>, vector<32x128xf32> -> vector<32x128xf32>
    %61 = arith.addf %56, %60 : vector<32x128xf32>
    %c2_28 = arith.constant 2 : index
    %c0_29 = arith.constant 0 : index
    %c0_30 = arith.constant 0 : index
    %62 = vector.load %arg6[%c2_28, %c0_29, %c0_30] : memref<3x32x8xbf16, #tpu.memory_space<vmem>>, vector<1x32x8xbf16>
    %63 = vector.shape_cast %62 : vector<1x32x8xbf16> to vector<32x8xbf16>
    %64 = vector.extract_strided_slice %52 {offsets = [0, 2], sizes = [8, 128], strides = [1, 1]} : vector<8x130xbf16> to vector<8x128xbf16>
    %cst_31 = arith.constant dense<0.000000e+00> : vector<32x128xf32>
    %65 = tpu.matmul %63, %64, %cst_31 {dimension_numbers = #tpu.dot_dimension_numbers<[1], [0], [0], [1], [0, 0, 1, 1], [], []>} : vector<32x8xbf16>, vector<8x128xbf16>, vector<32x128xf32> -> vector<32x128xf32>
    %66 = arith.addf %61, %65 : vector<32x128xf32>
    %67 = arith.truncf %66 : vector<32x128xf32> to vector<32x128xbf16>
    %c0_32 = arith.constant 0 : index
    %c0_33 = arith.constant 0 : index
    %68 = vector.load %arg7[%c0_32, %c0_33] : memref<32x1xbf16, #tpu.memory_space<vmem>>, vector<32x1xbf16>
    %69 = vector.broadcast %68 : vector<32x1xbf16> to vector<32x128xbf16>
    %70 = arith.addf %67, %69 : vector<32x128xbf16>
    %71 = arith.mulf %70, %70 : vector<32x128xbf16>
    %72 = arith.mulf %70, %71 : vector<32x128xbf16>
    %cst_34 = arith.constant 4.467770e-02 : bf16
    %73 = vector.broadcast %cst_34 : bf16 to vector<32x128xbf16>
    %74 = arith.mulf %73, %72 : vector<32x128xbf16>
    %75 = arith.addf %70, %74 : vector<32x128xbf16>
    %cst_35 = arith.constant 7.968750e-01 : bf16
    %76 = vector.broadcast %cst_35 : bf16 to vector<32x128xbf16>
    %77 = arith.mulf %76, %75 : vector<32x128xbf16>
    %78 = math.tanh %77 : vector<32x128xbf16>
    %cst_36 = arith.constant 1.000000e+00 : bf16
    %79 = vector.broadcast %cst_36 : bf16 to vector<32x128xbf16>
    %80 = arith.addf %79, %78 : vector<32x128xbf16>
    %cst_37 = arith.constant 5.000000e-01 : bf16
    %81 = vector.broadcast %cst_37 : bf16 to vector<32x128xbf16>
    %82 = arith.mulf %81, %80 : vector<32x128xbf16>
    %83 = arith.mulf %70, %82 : vector<32x128xbf16>
    %c0_38 = arith.constant 0 : index
    %c0_39 = arith.constant 0 : index
    %84 = vector.load %arg8[%c0_38, %c0_39] : memref<16x32xbf16, #tpu.memory_space<vmem>>, vector<16x32xbf16>
    %cst_40 = arith.constant dense<0.000000e+00> : vector<16x128xf32>
    %85 = tpu.matmul %84, %83, %cst_40 {dimension_numbers = #tpu.dot_dimension_numbers<[1], [0], [0], [1], [0, 0, 1, 1], [], []>} : vector<16x32xbf16>, vector<32x128xbf16>, vector<16x128xf32> -> vector<16x128xf32>
    %c0_41 = arith.constant 0 : index
    %c0_42 = arith.constant 0 : index
    %86 = vector.load %arg9[%c0_41, %c0_42] : memref<16x1xf32, #tpu.memory_space<vmem>>, vector<16x1xf32>
    %87 = vector.broadcast %86 : vector<16x1xf32> to vector<16x128xf32>
    %88 = arith.addf %85, %87 : vector<16x128xf32>
    %89 = arith.truncf %88 : vector<16x128xf32> to vector<16x128xbf16>
    %c0_43 = arith.constant 0 : index
    %c0_44 = arith.constant 0 : index
    %c0_45 = arith.constant 0 : index
    %90 = vector.load %arg10[%c0_43, %c0_44, %c0_45] : memref<1x16x128xbf16, #tpu.memory_space<vmem>>, vector<1x16x128xbf16>
    %91 = vector.shape_cast %90 : vector<1x16x128xbf16> to vector<16x128xbf16>
    %92 = vector.shape_cast %89 : vector<16x128xbf16> to vector<1x16x128xbf16>
    tpu.vector_store %arg10[%c0_43, %c0_44, %c0_45], %92 {strides = array<i32>} : memref<1x16x128xbf16, #tpu.memory_space<vmem>>, vector<1x16x128xbf16>,
    return
  }
  func.func @transform_0(%arg0: i32, %arg1: i32) -> (i32, i32, i32) {
    %c0_i32 = arith.constant 0 : i32
    %c0_i32_0 = arith.constant 0 : i32
    %c0_i32_1 = arith.constant 0 : i32
    return %arg0, %c0_i32, %c0_i32_0 : i32, i32, i32
  }
  func.func @transform_1(%arg0: i32, %arg1: i32) -> (i32, i32, i32) {
    %c0_i32 = arith.constant 0 : i32
    %c0_i32_0 = arith.constant 0 : i32
    %c0_i32_1 = arith.constant 0 : i32
    %c0_i32_2 = arith.constant 0 : i32
    return %c0_i32, %c0_i32_0, %c0_i32_1 : i32, i32, i32
  }
  func.func @transform_2(%arg0: i32, %arg1: i32) -> (i32, i32) {
    %c0_i32 = arith.constant 0 : i32
    %c0_i32_0 = arith.constant 0 : i32
    %c0_i32_1 = arith.constant 0 : i32
    return %c0_i32, %c0_i32_0 : i32, i32
  }
  func.func @transform_3(%arg0: i32, %arg1: i32) -> (i32, i32) {
    %c0_i32 = arith.constant 0 : i32
    %c0_i32_0 = arith.constant 0 : i32
    %c0_i32_1 = arith.constant 0 : i32
    return %c0_i32, %c0_i32_0 : i32, i32
  }
  func.func @transform_4(%arg0: i32, %arg1: i32) -> (i32, i32, i32) {
    %c0_i32 = arith.constant 0 : i32
    %c0_i32_0 = arith.constant 0 : i32
    %c0_i32_1 = arith.constant 0 : i32
    %c0_i32_2 = arith.constant 0 : i32
    return %c0_i32, %c0_i32_0, %c0_i32_1 : i32, i32, i32
  }
  func.func @transform_5(%arg0: i32, %arg1: i32) -> (i32, i32) {
    %c0_i32 = arith.constant 0 : i32
    %c0_i32_0 = arith.constant 0 : i32
    %c0_i32_1 = arith.constant 0 : i32
    return %c0_i32, %c0_i32_0 : i32, i32
  }
  func.func @transform_6(%arg0: i32, %arg1: i32) -> (i32, i32) {
    %c0_i32 = arith.constant 0 : i32
    %c0_i32_0 = arith.constant 0 : i32
    %c0_i32_1 = arith.constant 0 : i32
    return %c0_i32, %c0_i32_0 : i32, i32
  }
  func.func @transform_7(%arg0: i32, %arg1: i32) -> (i32, i32) {
    %c0_i32 = arith.constant 0 : i32
    %c0_i32_0 = arith.constant 0 : i32
    %c0_i32_1 = arith.constant 0 : i32
    return %c0_i32, %c0_i32_0 : i32, i32
  }
  func.func @transform_8(%arg0: i32, %arg1: i32) -> (i32, i32, i32) {
    %c0_i32 = arith.constant 0 : i32
    %c0_i32_0 = arith.constant 0 : i32
    return %arg0, %c0_i32, %arg1 : i32, i32, i32
  }
}

</mosaic_0001>

<bundles_post_ra>
// kernel: ae_forward.1
= control target key start
LH: loop header
LB: loop body
LE: loop exit
PB: predicated region body
PF: predicated region fallthrough
CT: control target
= control target key end

     0   :  { %13 = vsyncpa [#allocation3], 0  ;;  %s1946_s0 = inlined_call_operand.vmem [shape: bf16[2,16,260], index: 0, kind: input, shape index: {}]   ;;  %s1947_s1 = inlined_call_operand.vmem [shape: bf16[3,32,16], index: 1, kind: input, shape index: {}]   ;;  %s1948_s2 = inlined_call_operand.vmem [shape: bf16[32,1], index: 2, kind: input, shape index: {}]   ;;  %s1949_s3 = inlined_call_operand.vmem [shape: bf16[8,32], index: 3, kind: input, shape index: {}]   ;;  %s1950_s4 = inlined_call_operand.vmem [shape: bf16[3,32,8], index: 4, kind: input, shape index: {}]   ;;  %s1951_s5 = inlined_call_operand.vmem [shape: bf16[32,1], index: 5, kind: input, shape index: {}]   ;;  %s1952_s6 = inlined_call_operand.vmem [shape: bf16[16,32], index: 6, kind: input, shape index: {}]   ;;  %s1953_s7 = inlined_call_operand.vmem [shape: f32[16,1], index: 7, kind: input, shape index: {}]   ;;  %s1954_s8 = inlined_call_operand.hbm [shape: bf16[2,16,256], index: 8, kind: output, shape index: {}]  }
   0x1   :  { %15 = vsyncpa [#allocation3 + $0x1], 0  ;;  %s1668_s27 = smov 0   ;;  %s1670_s28 = smov 0  }
   0x2   :  { %s1672_s29 = smov 0   ;;  %s1674_s30 = smov 0  }
   0x3   :  { %s1676_s9 = smov 0   ;;  %s1678_s10 = smov 0  }
   0x4   :  { %s1680_s11 = smov 0   ;;  %s1682_s12 = smov 0  }
   0x5 LB: > { %s1264_s13 = sadd.s32 4294967295, %s1611_s12   ;;  %s1265_s14 = sadd.s32 4294967294, %s1611_s12   ;;  %s1611_s12 = sphi %s1682_s12, %s21_s12   ;;  %s1607_s11 = sphi %s1680_s11, %s1966_s11   ;;  %s1603_s10 = sphi %s1678_s10, %s1965_s10   ;;  %s1599_s9 = sphi %s1676_s9, %s1964_s9   ;;  %s1595_s30 = sphi %s1674_s30, %s1963_s30   ;;  %s1591_s29 = sphi %s1672_s29, %s1962_s29   ;;  %s1587_s28 = sphi %s1670_s28, %s1961_s28   ;;  %s1583_s27 = sphi %s1668_s27, %s1960_s27  }
   0x6   : > { %s30_s15 = sadd.s32 1, %s1603_s10  ;;  %s33_s16 = sadd.s32 1, %s1607_s11 }
   0x7   : > { %p31_p0 = scmp.ge.s32.totalorder %s30_s15, 2  ;;  %p225_p1 = scmp.ne.s32.totalorder %s1591_s29, %s1587_s28 }
   0x8   : > { %p226_p2 = scmp.eq.s32.totalorder %s1264_s13, 3  ;;  %p231_p5 = scmp.ne.s32.totalorder %s1587_s28, %s1583_s27 }
   0x9   : > { %s1968_s15 = smov (%p31_p0, %s30_s15), 0  ;;  %s1970_s16 = smov (!%p31_p0, %s33_s16), %s1607_s11 }
   0xa   : > { %s211_s17 = ssub.s32 %s1603_s10, %s1968_s15  ;;  %p1719_p3 = por %p226_p2, %p225_p1 }
   0xb   : > { %p35_p4 = scmp.ge.s32.totalorder %s1970_s16, 2  ;;  %p232_p6 = scmp.eq.s32.totalorder %s1265_s14, 3 }
   0xc   : > { %p1268_p7 = scmp.ge.s32.totalorder %s1611_s12, 1  ;;  %p279_p9 = scmp.lt.s32.totalorder %s1611_s12, 5 }
   0xd   : > { %s1972_s16 = smov (%p35_p4, %s1970_s16), 0  ;;  %p1728_p8 = por %p232_p6, %p231_p5 }
   0xe   : > { %1957 = sst [smem:[#allocation5_spill]] %s1972_s16  ;;  %s210_s20 = ssub.s32 %s1607_s11, %s1972_s16 }
   0xf   : > { %s215_s21 = sadd.s32 1, %s1591_s29  ;;  %s212_s22 = sor.u32 %s211_s17, %s210_s20 }
  0x10   : > { %p280_p10 = pnand %p1268_p7, %p279_p9  ;;  %p213_p11 = scmp.eq.s32.totalorder %s212_s22, 0 }
  0x11   : > { %p313_p12 = scmp.lt.s32.totalorder (!%p280_p10), %s1599_s9, 1  ;;  %s1271_s24 = sshll.u32 (!%p280_p10), %s1595_s30, 7  ;;  %v604_v0 = vlaneseq (!%p280_p10)  ;;  %v1613_v2 = vmov (!%p280_p10), 0   ;;  %v593_v9 = vld [vmem:[%s1948_s2 + $0x4] sm:$0xf] (!%p280_p10)  ;;  %vm363_vm0 = vcmask (!%p280_p10), 1039360  }
  0x12   : > { %s1737_s23 = scalar_select %p213_p11, %s1591_s29, %s215_s21  }
  0x13   : > { %283 = sbr.rel (%p280_p10) target bundleno = 1307 (0x51b), region = 52  ;;  %s326_s25 = sshra.s32 (!%p280_p10), %s1271_s24, 7  ;;  %v747_v1 = vand.u32 (!%p280_p10), 127, %v604_v0  ;;  %406 = vmatprep.mubr.bf16.mxu0 (!%p280_p10), %v1613_v2  ;;  %1484 = vset.pattern.permute.xlu1 (!%p280_p10), %v1613_v2  ;;  %v592_v10 = vld [vmem:[%s1948_s2] sm:$0xf] (!%p280_p10)  ;;  %v1488_v17 = vld [vmem:[%s1947_s1 + $0x10] sm:$0xff] (!%p280_p10)  }
  0x14   : > { %s1298_s13 = sadd.s32 (!%p280_p10), 4294967295, %s1271_s24  ;;  %s1272_s17 = sshll.u32 (!%p280_p10), %s326_s25, 2  ;;  %1483 = vset.pattern.permute.xlu0 (!%p280_p10), %v1613_v2  ;;  %733 = vmatprep.mubr.bf16.mxu1 (!%p280_p10), %v1613_v2  ;;  %v594_v11 = vld [vmem:[%s1948_s2 + $0x8] sm:$0xf] (!%p280_p10)  ;;  %v595_v12 = vld [vmem:[%s1948_s2 + $0xc] sm:$0xf] (!%p280_p10) }
  0x15   : > { %v748_v3 = vadd.s32 (!%p280_p10), 128, %v747_v1  ;;  %v750_v4 = vstv (!%p280_p10), %s1298_s13  ;;  %s1614_s16 = smov (!%p280_p10), 127   ;;  %s1615_s25 = smov (!%p280_p10), 126   ;;  %vm367_vm1 = vcmask (!%p280_p10), 130048   ;;  %v1489_v19 = vld [vmem:[%s1947_s1 + $0x18] sm:$0xff] (!%p280_p10)   ;;  %vm517_vm2 = vcmask (!%p280_p10), 1031168  }
  0x16   : > { %v1747_v5 = vadd.s32 (!%p280_p10), %v750_v4, %v747_v1  ;;  %v1490_v20 = vld [vmem:[%s1947_s1] sm:$0xff] (!%p280_p10)   ;;  %v1491_v22 = vld [vmem:[%s1947_s1 + $0x8] sm:$0xff] (!%p280_p10)   ;;  %v1616_v25 = vmov (!%p280_p10), 839922192   ;;  %v1802_v28 = vshrl.u32 (!%p280_p10), %v604_v0, 7  ;;  %vm697_vm3 = vcmask (!%p280_p10), 261120  }
  0x17   : > { %v1752_v6 = vadd.s32 (!%p280_p10), %v750_v4, %v748_v3  ;;  %v1492_v23 = vld [vmem:[%s1947_s1 + $0x20] sm:$0xff] (!%p280_p10)   ;;  %v1493_v24 = vld [vmem:[%s1947_s1 + $0x28] sm:$0xff] (!%p280_p10)   ;;  %v602_v26 = vunpack.c.l.s4 (!%p280_p10), %v1616_v25  ;;  %vm803_vm11 = vcmask (!%p280_p10), 64512   ;;  %vm810_vm14 = vcmask (!%p280_p10), 1043456  }
  0x18   : > { %vm753_vm4 = vcmp.ge.s32.totalorder (!%p280_p10), %v1747_v5, 0  ;;  %vm755_vm6 = vcmp.lt.s32.totalorder (!%p280_p10), %v1747_v5, 200  ;;  %v1494_v5 = vld [vmem:[%s1950_s4 + $0x10] sm:$0xff] (!%p280_p10)   ;;  %vm1618_vm15 = vmmov (!%p280_p10), 0  }
  0x19   : > { %v603_v27 = vunpack.c.0.s8 (!%p280_p10), %v602_v26  ;;  %vm754_vm5 = vcmp.ge.s32.totalorder (!%p280_p10), %v1752_v6, 0  ;;  %vm756_vm7 = vcmp.lt.s32.totalorder (!%p280_p10), %v1752_v6, 200  ;;  %vm757_vm8 = vmand (!%p280_p10), %vm753_vm4, %vm755_vm6 }
  0x1a   : > { %s314_s26 = scalar_select %p313_p12, %s1599_s9, 1  ;;  %vm758_vm9 = vmand %vm754_vm5, %vm756_vm7 }
  0x1b   : > { %v1805_v29 = vsub.s32 %v603_v27, %v1802_v28  ;;  %vm763_vm10 = vmpackc.low %vm758_vm9, %vm757_vm8 }
  0x1c   : > { %s1402_s14 = smul.u32 24, %s314_s26 }
  0x1e   : > { %s317_s22 = scalar_lea.vmem %s1946_s0, %s1402_s14 }
  0x1f   : > { %s329_s24 = scalar_lea.vmem %s317_s22, %s1272_s17  ;;  %s310_s17 = sand.u32 1, %s1587_s28  }
  0x20   : > { %v1485_v7 = vld [vmem:[%s329_s24] ss:$12 sps:$4 sm:$0xff]   ;;  %v1487_v8 = vld [vmem:[%s329_s24 + $0x4] ss:$12 sps:$4 sm:$0xff]   ;;  %s1269_s21 = sshll.u32 %s310_s17, 3  ;;  %s1326_s22 = sshll.u32 %s1599_s9, 2 }
  0x21   : > { %359 = vrot.lane.b32.xlu0 %v1485_v7, %s1614_s16  ;;  %513 = vrot.lane.b32.xlu1 %v1485_v7, %s1615_s25  ;;  %s1894_s14 = scalar_lea.sflag [#allocation3], %s310_s17 }
  0x25   : > { %361 = vrot.lane.b32.xlu0 %v1487_v8, %s1614_s16  ;;  %515 = vrot.lane.b32.xlu1 %v1487_v8, %s1615_s25 }
  0x29   : > { %610 = vperm.xlu1 %1484, %v593_v9   ;;  %598 = vperm.xlu0 %1483, %v592_v10  }
  0x2d   : > { %622 = vperm.xlu1 %1484, %v594_v11   ;;  %634 = vperm.xlu0 %1483, %v595_v12  }
  0x93   : > { %v360_v13 = vpop.permute.xlu0 %359  ;;  %v514_v14 = vpop.permute.xlu1 %513 }
  0x97   : > { %v362_v15 = vpop.permute.xlu0 %361  ;;  %v516_v18 = vpop.permute.xlu1 %515 }
  0x98   : > { %374 = vmatprep.subr.bf16.mxu0 %v362_v15  ;;  %v364_v16 = vsel %vm363_vm0, %v360_v13, %v362_v15  ;;  %v518_v21 = vsel %vm517_vm2, %v514_v14, %v516_v18 }
  0x99   : > { %375 = vmatpush1.bf16.msra.mxu0 %v364_v16 }
  0x9a   : > { %445 = vmatprep.subr.bf16.mxu0 %v1487_v8 }
  0x9c   : > { %1281 = vmatmul.mubr.msk.bf16.vlgmr.msra.gmra.mrb[0].mxu0 %vm367_vm1, %v1488_v17 }
  0x9d   : > { %446 = vmatpush1.bf16.msra.mxu0 %v1485_v7  ;;  %416 = vmatprep.mubr.bf16.mxu0 %v1613_v2 }
  0x9e   : > { %527 = vmatprep.subr.bf16.mxu0 %v516_v18 }
  0xa4   : > { %1282 = vmatmul.mubr.msk.bf16.gmra.mrb[4].mxu0 %vm367_vm1, %v1489_v19 }
  0xa5   : > { %477 = vmatprep.mubr.bf16.mxu0 %v1613_v2 }
  0xa8   : > { %v611_v30 = vpop.permute.xlu1 %610  ;;  %v599_v31 = vpop.permute.xlu0 %598 }
  0xa9   : > { %v619_v32 = vrot.slane %v611_v30, %v1805_v29  ;;  %v607_v33 = vrot.slane %v599_v31, %v1805_v29 }
  0xab   : > { %v1295_v35 = vcombine.low %v607_v33, %v619_v32  ;;  %v696_v33 = vld [vmem:[%s1949_s3] sm:$0xf] }
  0xac   : > { %1285 = vmatmul.mubr.msk.bf16.vlgmr.msra.gmra.mrb[0].mxu0 %vm367_vm1, %v1490_v20  ;;  %v623_v41 = vpop.permute.xlu1 %622  ;;  %v635_v42 = vpop.permute.xlu0 %634 }
  0xad   : > { %528 = vmatpush1.bf16.msra.mxu0 %v518_v21  ;;  %487 = vmatprep.mubr.bf16.mxu0 %v1613_v2  ;;  %v631_v46 = vrot.slane %v623_v41, %v1805_v29  ;;  %v643_v47 = vrot.slane %v635_v42, %v1805_v29  ;;  %v764_v41 = vsel %vm763_vm10, 65537, %v1613_v2  ;;  %v771_v42 = vsub.s32 4, %v1802_v28 }
  0xaf   : > { %v1296_v54 = vcombine.low %v631_v46, %v643_v47 }
  0xb4   : > { %1286 = vmatmul.mubr.msk.bf16.gmra.mrb[4].mxu0 %vm367_vm1, %v1491_v22 }
  0xb5   : > { %559 = vmatprep.mubr.bf16.mxu0 %v1613_v2 }
  0xbc   : > { %1293 = vmatmul.mubr.msk.bf16.vlgmr.msra.gmra.mrb[0].mxu0 %vm367_vm1, %v1492_v23 }
  0xbd   : > { %569 = vmatprep.mubr.bf16.mxu0 %v1613_v2  ;;  %v1015_v2 = vld [vmem:[%s1951_s5] sm:$0xf] }
  0xc4   : > { %1294 = vmatmul.mubr.msk.bf16.gmra.mrb[4].mxu0 %vm367_vm1, %v1493_v24 }
 0x18f   : > { %v561_v34 = vpop.f32.mrb[0].mxu0 }
 0x190   : > { %v563_v36 = vpop.f32.mrb[1].mxu0 }
 0x191   : > { %v565_v37 = vpop.f32.mrb[2].mxu0 }
 0x192   : > { %v588_v38 = vpack.c.bf16 %v565_v37, %v561_v34  ;;  %v567_v39 = vpop.f32.mrb[3].mxu0 }
 0x193   : > { %v589_v40 = vpack.c.bf16 %v567_v39, %v563_v36 }
 0x194   : > { %v656_v43 = vadd.bf16 %v1295_v35, %v588_v38 }
 0x195   : > { %v657_v44 = vadd.bf16 %v1295_v35, %v589_v40  ;;  %v767_v40 = vsub.s32 0, %v1802_v28  ;;  %v1016_v28 = vld [vmem:[%s1951_s5 + $0x4] sm:$0xf] }
 0x196   : > { %v660_v45 = vmul.bf16 %v656_v43, %v656_v43 }
 0x197   : > { %v661_v48 = vmul.bf16 %v657_v44, %v657_v44  ;;  %v571_v49 = vpop.f32.mrb[4].mxu0  ;;  %v768_v6 = vrot.slane %v764_v41, %v767_v40 }
 0x198   : > { %v573_v50 = vpop.f32.mrb[5].mxu0  ;;  %v664_v51 = vmul.bf16 %v660_v45, %v656_v43 }
 0x199   : > { %v575_v52 = vpop.f32.mrb[6].mxu0  ;;  %v665_v53 = vmul.bf16 %v661_v48, %v657_v44  ;;  %vm773_vm12 = vcmp.ne.s16.totalorder %v768_v6, 0  ;;  %v1017_v48 = vld [vmem:[%s1951_s5 + $0x8] sm:$0xf] }
 0x19a   : > { %v590_v55 = vpack.c.bf16 %v575_v52, %v571_v49  ;;  %v577_v56 = vpop.f32.mrb[7].mxu0  ;;  %v668_v57 = vmul.bf16 1027030327, %v664_v51  ;;  %v1018_v49 = vld [vmem:[%s1951_s5 + $0xc] sm:$0xf] }
 0x19b   : > { %v591_v58 = vpack.c.bf16 %v577_v56, %v573_v50  ;;  %v669_v59 = vmul.bf16 1027030327, %v665_v53  ;;  %v1101_v50 = vld [vmem:[%s1953_s7] sm:$0xff]  ;;  %v1102_v51 = vld [vmem:[%s1953_s7 + $0x8] sm:$0xff]  ;;  %v1495_v56 = vld [vmem:[%s1950_s4 + $0x18] sm:$0xff]  }
 0x19c   : > { %v658_v60 = vadd.bf16 %v1296_v54, %v590_v55  ;;  %v672_v61 = vadd.bf16 %v668_v57, %v656_v43  ;;  %v1496_v57 = vld [vmem:[%s1950_s4] sm:$0xff]  }
 0x19d   : > { %v659_v62 = vadd.bf16 %v1296_v54, %v591_v58  ;;  %v673_v63 = vadd.bf16 %v669_v59, %v657_v44 }
 0x19e   : > { %v662_v0 = vmul.bf16 %v658_v60, %v658_v60  ;;  %v676_v1 = vmul.bf16 1061961548, %v672_v61 }
 0x19f   : > { %v663_v3 = vmul.bf16 %v659_v62, %v659_v62  ;;  %v677_v4 = vmul.bf16 1061961548, %v673_v63  ;;  %v1498_v63 = vld [vmem:[%s1950_s4 + $0x20] sm:$0xff]  }
 0x1a0   : > { %v666_v7 = vmul.bf16 %v662_v0, %v658_v60  ;;  %1501 = vtanh.bf16 %v676_v1  ;;  %v1499_v1 = vld [vmem:[%s1950_s4 + $0x28] sm:$0xff]  }
 0x1a1   : > { %v667_v8 = vmul.bf16 %v663_v3, %v659_v62  ;;  %1503 = vtanh.bf16 %v677_v4  ;;  %v1617_v3 = vmov 0.0  }
 0x1a2   : > { %v670_v9 = vmul.bf16 1027030327, %v666_v7 }
 0x1a3   : > { %v671_v10 = vmul.bf16 1027030327, %v667_v8 }
 0x1a4   : > { %v674_v11 = vadd.bf16 %v670_v9, %v658_v60 }
 0x1a5   : > { %v675_v12 = vadd.bf16 %v671_v10, %v659_v62 }
 0x1a6   : > { %v678_v13 = vmul.bf16 1061961548, %v674_v11 }
 0x1a7   : > { %v679_v14 = vmul.bf16 1061961548, %v675_v12 }
 0x1a8   : > { %1505 = vtanh.bf16 %v678_v13 }
 0x1a9   : > { %1507 = vtanh.bf16 %v679_v14 }
 0x1ab   : > { %v1502_v15 = vpop.eup %1501 }
 0x1ac   : > { %v1504_v16 = vpop.eup %1503  ;;  %v684_v17 = vadd.bf16 1065369472, %v1502_v15 }
 0x1ad   : > { %v685_v18 = vadd.bf16 1065369472, %v1504_v16 }
 0x1ae   : > { %v688_v19 = vmul.bf16 1056980736, %v684_v17 }
 0x1af   : > { %v689_v20 = vmul.bf16 1056980736, %v685_v18 }
 0x1b0   : > { %v692_v22 = vmul.bf16 %v688_v19, %v656_v43  ;;  %v772_v43 = vrot.slane %v764_v41, %v771_v42 }
 0x1b1   : > { %v693_v21 = vmul.bf16 %v689_v20, %v657_v44 }
 0x1b2   : > { %vm774_vm13 = vcmp.ne.s16.totalorder %v772_v43, 0 }
 0x1b3   : > { %v1506_v23 = vpop.eup %1505  ;;  %701 = vmatprep.subr.bf16.mxu1 %v693_v21 }
 0x1b4   : > { %v1508_v24 = vpop.eup %1507  ;;  %702 = vmatpush1.bf16.msra.mxu1 %v692_v22  ;;  %v686_v25 = vadd.bf16 1065369472, %v1506_v23 }
 0x1b5   : > { %v687_v26 = vadd.bf16 1065369472, %v1508_v24 }
 0x1b6   : > { %v690_v27 = vmul.bf16 1056980736, %v686_v25 }
 0x1b7   : > { %v691_v30 = vmul.bf16 1056980736, %v687_v26 }
 0x1b8   : > { %v694_v32 = vmul.bf16 %v690_v27, %v658_v60 }
 0x1b9   : > { %v695_v31 = vmul.bf16 %v691_v30, %v659_v62  ;;  %v1497_v62 = vld [vmem:[%s1950_s4 + $0x8] sm:$0xff]  }
 0x1bb   : > { %703 = vmatprep.subr.bf16.mxu1 %v695_v31 }
 0x1bc   : > { %704 = vmatpush1.bf16.msra.mxu1 %v694_v32 }
 0x1bf   : > { %1297 = vmatmul.mubr.msk.bf16.vlgmr.msra.gmra.mrb[0].mxu1 %vm697_vm3, %v696_v33 }
 0x1c0   : > { %1351 = vmatprep.mubr.msk.bf16.mxu1 %vm803_vm11, %v1494_v5  ;;  %v1500_v5 = vld [vmem:[%s1952_s6] sm:$0xff]  }
 0x292   : > { %v735_v34 = vpop.f32.mrb[0].mxu1 }
 0x293   : > { %v742_v35 = vpack.c.bf16 %v735_v34, %v735_v34  ;;  %v737_v36 = vpop.f32.mrb[1].mxu1 }
 0x294   : > { %v743_v37 = vpack.c.bf16 %v737_v36, %v737_v36  ;;  %v739_v38 = vpop.f32.mrb[2].mxu1 }
 0x295   : > { %1509 = vtanh.bf16 %v742_v35  ;;  %v740_v39 = vpop.f32.mrb[3].mxu1 }
 0x296   : > { %1511 = vtanh.bf16 %v743_v37 }
 0x2a0   : > { %v1510_v44 = vpop.eup %1509 }
 0x2a1   : > { %v1512_v45 = vpop.eup %1511  ;;  %v775_v46 = vsel %vm773_vm12, %v1510_v44, 0 }
 0x2a2   : > { %798 = vrot.lane.b32.xlu1 %v775_v46, %s1614_s16  ;;  %v776_v47 = vsel %vm774_vm13, %v1512_v45, 0  ;;  %v880_v60 = vsel %vm810_vm14, %v775_v46, 0 }
 0x2a3   : > { %800 = vrot.lane.b32.xlu0 %v776_v47, %s1614_s16  ;;  %s1184_s16 = sadd.s32 %s1595_s30, %s1326_s22 }
 0x2a4   : > { %s1327_s26 = sshll.u32 %s1184_s16, 6 }
 0x2a5   : > { %s1892_s30 = scalar_lea.hbm %s1954_s8, %s1327_s26 }
 0x2a6   : > { %946 = vrot.lane.b32.xlu1 %v775_v46, %s1615_s25 }
 0x2a7   : > { %948 = vrot.lane.b32.xlu0 %v776_v47, %s1615_s25  ;;  %s312_s25 = scalar_lea.vmem [#allocation2], %s1269_s21  ;;  %s1619_s21 = smov [#allocation2]  }
 0x2a8   : > { %s1187_s24 = sshll.u32 %s312_s25, 4  ;;  %s1521_s22 = sshll.u32 %s1619_s21, 4  ;;  %s1887_s24 = int_to_ptr.vmem [resolvable:$true] %s1187_s24  ;;  %s1522_s22 = int_to_ptr.vmem [resolvable:$false] %s1521_s22 }
 0x2a9   : > { %s1517_s20 = scalar_lea.vmem %s1887_s24, 128  ;;  %s1523_s16 = scalar_lea.vmem %s1522_s22, 256 }
 0x2aa   : > { %1021 = vperm.xlu1 %1484, %v1015_v2   ;;  %p1518_p13 = scmp.ne.s32.totalorder %s1887_s24, %s1517_s20  ;;  %p1524_p2 = scmp.lt.s32.totalorder %s1887_s24, %s1522_s22 }
 0x2ab   : > { %1033 = vperm.xlu0 %1483, %v1016_v28   ;;  %p1525_p4 = scmp.lt.s32.totalorder %s1523_s16, %s1517_s20 }
 0x2ac   : > { %p1519_p0 = pnand %p1518_p13, %p1719_p3 }
 0x2ad   : > { %p1526_p5 = por %p1525_p4, %p1524_p2 }
 0x2ae   : > { %1045 = vperm.xlu1 %1484, %v1017_v48   ;;  %p1520_p1 = pneg %p1519_p0 }
 0x2af   : > { %1057 = vperm.xlu0 %1483, %v1018_v49  }
 0x2b0   : > { %p1527_p6 = pnand %p1526_p5, %p1520_p1 }
 0x2b2   : > { %1105 = vperm.xlu1 %1484, %v1101_v50  }
 0x2b3   : > { %1110 = vperm.xlu0 %1483, %v1102_v51  }
 0x314   : > { %v799_v52 = vpop.permute.xlu1 %798 }
 0x315   : > { %v801_v53 = vpop.permute.xlu0 %800 }
 0x316   : > { %v802_v54 = vsel %vm363_vm0, %v799_v52, %v801_v53 }
 0x317   : > { %v812_v55 = vsel %vm810_vm14, %v802_v54, 0  ;;  %1399 = vmatprep.subr.msk.bf16.mxu1 %vm810_vm14, %v802_v54 }
 0x318   : > { %1350 = vmatpush3.bf16.msra.mxu1 %v812_v55  ;;  %v947_v58 = vpop.permute.xlu1 %946 }
 0x319   : > { %1400 = vmatprep.subr.msk.bf16.mxu1 %vm810_vm14, %v775_v46  ;;  %v949_v59 = vpop.permute.xlu0 %948 }
 0x31a   : > { %v950_v61 = vsel %vm517_vm2, %v947_v58, %v949_v59 }
 0x31b   : > { %1352 = vmatmul.mubr.msk.bf16.vlgmr.msra.gmra.mrb[4].mxu1 %vm803_vm11, %v1495_v56  ;;  %v958_v0 = vsel %vm810_vm14, %v950_v61, 0 }
 0x31c   : > { %1356 = vmatpush3.bf16.msra.mxu1 %v880_v60  ;;  %1357 = vmatprep.mubr.msk.bf16.mxu1 %vm803_vm11, %v1496_v57 }
 0x31d   : > { %1401 = vmatprep.subr.msk.bf16.mxu1 %vm810_vm14, %v950_v61 }
 0x327   : > { %1358 = vmatmul.mubr.msk.bf16.vlgmr.msra.gmra.mrb[4].mxu1 %vm803_vm11, %v1497_v62 }
 0x328   : > { %1362 = vmatpush3.bf16.msra.mxu1 %v958_v0  ;;  %1363 = vmatprep.mubr.msk.bf16.mxu1 %vm803_vm11, %v1498_v63 }
 0x329   : > { %1367 = vmatprep.subr.bf16.mxu1 %v1617_v3  ;;  %v1022_v4 = vpop.permute.xlu1 %1021 }
 0x32a   : > { %v1034_v7 = vpop.permute.xlu0 %1033  ;;  %v1030_v12 = vrot.slane %v1022_v4, %v1805_v29 }
 0x32b   : > { %v1042_v13 = vrot.slane %v1034_v7, %v1805_v29 }
 0x32d   : > { %v1046_v8 = vpop.permute.xlu1 %1045  ;;  %v1319_v20 = vcombine.low %v1030_v12, %v1042_v13 }
 0x32e   : > { %v1058_v9 = vpop.permute.xlu0 %1057  ;;  %v1054_v10 = vrot.slane %v1046_v8, %v1805_v29 }
 0x32f   : > { %v1066_v11 = vrot.slane %v1058_v9, %v1805_v29 }
 0x331   : > { %v1320_v17 = vcombine.low %v1054_v10, %v1066_v11  ;;  %v1106_v43 = vpop.permute.xlu1 %1105 }
 0x332   : > { %v1111_v45 = vpop.permute.xlu0 %1110 }
 0x333   : > { %1364 = vmatmul.mubr.msk.bf16.vlgmr.msra.gmra.mrb[4].mxu1 %vm803_vm11, %v1499_v1 }
 0x334   : > { %1371 = vmatprep.mubr.msk.bf16.mxu1 %vm1618_vm15, %v1617_v3 }
 0x406   : > { %v1365_v14 = vpop.f32.mrb[4].mxu1 }
 0x407   : > { %v994_v15 = vpop.f32.mrb[5].mxu1 }
 0x408   : > { %v1366_v16 = vpop.f32.mrb[6].mxu1 }
 0x409   : > { %v1014_v18 = vpack.c.bf16 %v1366_v16, %v1365_v14  ;;  %v997_v19 = vpop.f32.mrb[7].mxu1 }
 0x40a   : > { %v1013_v21 = vpack.c.bf16 %v997_v19, %v994_v15 }
 0x40b   : > { %v1080_v22 = vadd.bf16 %v1320_v17, %v1014_v18 }
 0x40c   : > { %v1079_v23 = vadd.bf16 %v1319_v20, %v1013_v21 }
 0x40d   : > { %v1082_v24 = vmul.bf16 %v1080_v22, %v1080_v22 }
 0x40e   : > { %v1081_v25 = vmul.bf16 %v1079_v23, %v1079_v23 }
 0x40f   : > { %v1084_v26 = vmul.bf16 %v1082_v24, %v1080_v22 }
 0x410   : > { %v1083_v27 = vmul.bf16 %v1081_v25, %v1079_v23 }
 0x411   : > { %v1086_v30 = vmul.bf16 1027030327, %v1084_v26 }
 0x412   : > { %v1085_v31 = vmul.bf16 1027030327, %v1083_v27 }
 0x413   : > { %v1088_v32 = vadd.bf16 %v1086_v30, %v1080_v22 }
 0x414   : > { %v1087_v33 = vadd.bf16 %v1085_v31, %v1079_v23 }
 0x415   : > { %v1090_v34 = vmul.bf16 1061961548, %v1088_v32 }
 0x416   : > { %v1089_v29 = vmul.bf16 1061961548, %v1087_v33 }
 0x417   : > { %1513 = vtanh.bf16 %v1090_v34 }
 0x418   : > { %1515 = vtanh.bf16 %v1089_v29 }
 0x422   : > { %v1514_v35 = vpop.eup %1513 }
 0x423   : > { %v1516_v36 = vpop.eup %1515  ;;  %v1094_v38 = vadd.bf16 1065369472, %v1514_v35 }
 0x424   : > { %v1093_v37 = vadd.bf16 1065369472, %v1516_v36 }
 0x425   : > { %v1096_v41 = vmul.bf16 1056980736, %v1094_v38 }
 0x426   : > { %v1095_v39 = vmul.bf16 1056980736, %v1093_v37 }
 0x427   : > { %v1098_v42 = vmul.bf16 %v1096_v41, %v1080_v22 }
 0x428   : > { %v1097_v40 = vmul.bf16 %v1095_v39, %v1079_v23 }
 0x42a   : > { %1368 = vmatpush3.bf16.msra.mxu1 %v1097_v40 }
 0x42b   : > { %1369 = vmatprep.subr.bf16.mxu1 %v1617_v3 }
 0x42e   : > { %1370 = vmatpush3.bf16.msra.mxu1 %v1098_v42 }
 0x431   : > { %1372 = vmatmul.mubr.msk.bf16.vlgmr.msra.gmra.mrb[8].mxu1 %vm697_vm3, %v1500_v5 }
 0x504   : > { %v1155_v6 = vpop.f32.mrb[8].mxu1 }
 0x505   : > { %v1373_v44 = vpop.f32.mrb[9].mxu1  ;;  %v1156_v47 = vadd.f32 %v1155_v6, %v1106_v43 }
 0x506   : > { %v1158_v46 = vpop.f32.mrb[10].mxu1 }
 0x507   : > { %v1159_v2 = vadd.f32 %v1158_v46, %v1111_v45  ;;  %v1374_v28 = vpop.f32.mrb[11].mxu1 }
 0x509   : > { %v1335_v48 = vpack.c.bf16 %v1159_v2, %v1156_v47 }
 0x50b   : > { %1336 = vst [vmem:[%s312_s25] sm:$0xff] %v1335_v48  }
 0x50c   : > { %1530 = shalt.err (!%p1527_p6)
}
 0x50d   : > { %s1531_s17 = scalar_lea.hbm %s1892_s30, 128  ;;  %s1535_s13 = scalar_lea.hbm %s1954_s8, 512 }
 0x50e   : > { %p1532_p7 = scmp.ne.s32.totalorder %s1892_s30, %s1531_s17  ;;  %p1536_p11 = scmp.lt.u32.totalorder %s1892_s30, %s1954_s8 }
 0x50f   : > { %p1537_p12 = scmp.lt.u32.totalorder %s1535_s13, %s1531_s17  ;;  %p1539_p0 = scmp.lt.u32.totalorder %s1531_s17, %s1892_s30 }
 0x510   : > { %p1533_p9 = pnand %p1532_p7, %p1719_p3 }
 0x511   : > { %p1538_p13 = por %p1537_p12, %p1536_p11 }
 0x512   : > { %p1534_p10 = pneg %p1533_p9 }
 0x513   : > { %p1540_p1 = por %p1539_p0, %p1538_p13 }
 0x515   : > { %p1541_p2 = pnand %p1540_p1, %p1534_p10 }
 0x517   : > { %1544 = shalt.err (!%p1541_p2)
}
 0x518   : > { %s1620_s20 = smov 64   ;;  %s1621_s22 = smov 128  }
 0x519   : > { %s1622_s16 = smov 4  }
 0x51a   : > { %1403 = dma.vmem_to_hbm [thread:$0]  (%p1719_p3), %s1887_s24, 128, %s1892_s30, %s1894_s14, %s1620_s20, %s1621_s22, %s1622_s16  }
 0x51b PF: > { %p1409_p4 = scmp.ge.s32.totalorder %s1611_s12, 2  ;;  %s1202_s25 = sand.u32 1, %s1583_s27  }
 0x51c   : > { %s1203_s17 = scalar_lea.sflag [#allocation3], %s1202_s25 }
 0x51d   : > { %p1406_p5 = pnand %p1409_p4, %p1728_p8 }
 0x51f   : > { %1578 = dma.done.wait (!%p1406_p5), %s1203_s17, 128  }
 0x520   : > { %1580 = vsyncadd (!%p1406_p5), %s1203_s17, 4294967168  ;;  %s21_s12 = sadd.s32 1, %s1611_s12   ;;  %s1959_s18 = sld [smem:[#allocation5_spill]] }
 0x521   : > { %p18_p6 = scmp.ge.s32.totalorder %s21_s12, 6   ;;  %s1960_s27 = smov %s1587_s28 }
 0x522   : > { %s1961_s28 = smov %s1591_s29  ;;  %s1962_s29 = smov %s1737_s23 }
 0x523   : > { %s1963_s30 = smov %s1603_s10  ;;  %s1964_s9 = smov %s1607_s11 }
 0x524   : > { %s1965_s10 = smov %s1968_s15  ;;  %20 = sbr.rel (!%p18_p6) target bundleno = 5 (0x5), region = 92 }
 0x526   : > { %s1966_s11 = smov %s1959_s18 }
 0x52b   :  { %1208 = vsyncpa [#allocation3], 1 }
 0x52c   :  { %1210 = vsyncpa [#allocation3 + $0x1], 1 }

</bundles_post_ra>
